<compile_context>
chip_gen: v7x
topology: tpu7x:2x2x1
jax: 0.10.0
libtpu: 0.0.40
codegen_flags: <defaults>
</compile_context>

<pallas_src>
import jax
import jax.numpy as jnp
from jax.experimental import pallas as pl
from jax.experimental.pallas import tpu as pltpu

HIDDEN = 128


def dqn_mlp_kernel(x_ref, w1_ref, b1_ref, w2_ref, b2_ref, w3_ref, b3_ref, o_ref):
    """One batch tile of the fused 3-layer MLP.

    Shapes seen by the kernel (per grid step):
      x:  (tb, D_in)  f32      w1: (D_in, 128)  bf16   b1: (1, 128)      f32
                               w2: (128, 128)   bf16   b2: (1, 128)      f32
                               w3: (128, 128p)  bf16   b3: (1, out_dim)  f32
      o:  (tb, out_dim) f32   (128p = out_dim padded up to a multiple of 128;
                               only the first out_dim columns are stored)
    """
    cdt = w1_ref.dtype  # compute dtype for MXU inputs (bf16 by default, f32 optional)
    x = x_ref[...].astype(cdt)

    # Layer 1: Linear + ReLU (MXU matmul, f32 accumulation; ReLU+cast fused so
    # only a single copy of the intermediate stays live).
    h1 = jnp.dot(x, w1_ref[...], preferred_element_type=jnp.float32) + b1_ref[...]
    h1 = jnp.maximum(h1, 0.0).astype(cdt)

    # Layer 2: Linear + ReLU
    h2 = jnp.dot(h1, w2_ref[...], preferred_element_type=jnp.float32) + b2_ref[...]
    h2 = jnp.maximum(h2, 0.0).astype(cdt)

    # Layer 3: Linear (Q-values). w3 is padded 128-wide so the MXU stays
    # lane-dense; only the real out_dim columns are biased and stored.
    q = jnp.dot(h2, w3_ref[...], preferred_element_type=jnp.float32)
    o_ref[...] = (q[:, : o_ref.shape[-1]] + b3_ref[...]).astype(o_ref.dtype)


def _pick_batch_tile(batch, tile_b):
    """Sublane-aligned batch tile; prefers >= 2 tiles (v7x megacore split)."""
    half = pl.cdiv(pl.cdiv(batch, 2), 8) * 8
    return min(tile_b, max(8, half))


def dqn_forward(x, params, *, tile_b=2048):
    """params = (w1, b1, w2, b2, w3_padded, b3).

    w*: (in, out) in weight dtype (bf16 default); w3 pre-padded to a multiple of
    128 columns. b*: (1, out) f32; b3 keeps the true out_dim width.
    tile_b: max batch tile. 2048 fits comfortably in v5e's 16 MiB scoped VMEM;
    sweep up to ~4096 on v6e/v7x (raise vmem_limit_bytes if d_in is large).
    """
    w1, b1, w2, b2, w3, b3 = params
    B, d_in = x.shape
    hidden = w1.shape[1]
    out_pad = w3.shape[1]          # lane-dense compute width
    out_dim = b3.shape[1]          # true number of actions

    tb = _pick_batch_tile(B, tile_b)
    nb = pl.cdiv(B, tb)            # non-divisible edge block: Pallas masks writes

    flops = 2 * B * (d_in * hidden + hidden * hidden + hidden * out_pad)
    bytes_accessed = (
        x.size * x.dtype.itemsize
        + sum(a.size * a.dtype.itemsize for a in (w1, b1, w2, b2, w3, b3))
        + B * out_dim * 4
    )

    return pl.pallas_call(
        dqn_mlp_kernel,
        out_shape=jax.ShapeDtypeStruct((B, out_dim), jnp.float32),
        grid_spec=pltpu.PrefetchScalarGridSpec(
            num_scalar_prefetch=0,
            grid=(nb,),
            in_specs=[
                pl.BlockSpec((tb, d_in), lambda i: (i, 0)),         # x: tiled over batch
                pl.BlockSpec((d_in, hidden), lambda i: (0, 0)),     # w1: VMEM-resident
                pl.BlockSpec((1, hidden), lambda i: (0, 0)),        # b1
                pl.BlockSpec((hidden, hidden), lambda i: (0, 0)),   # w2
                pl.BlockSpec((1, hidden), lambda i: (0, 0)),        # b2
                pl.BlockSpec((hidden, out_pad), lambda i: (0, 0)),  # w3 (padded, compute only)
                pl.BlockSpec((1, out_dim), lambda i: (0, 0)),       # b3 (narrow)
            ],
            out_specs=pl.BlockSpec((tb, out_dim), lambda i: (i, 0)),  # narrow HBM output
        ),
        compiler_params=pltpu.CompilerParams(
            dimension_semantics=("parallel",),  # batch tiles split across TCs on v7x
        ),
        cost_estimate=pl.CostEstimate(
            flops=flops, transcendentals=0, bytes_accessed=bytes_accessed
        ),
    )(x, w1, b1, w2, b2, w3, b3)


def init_dqn_params(key, input_dim, output_dim, hidden=HIDDEN, weight_dtype=jnp.bfloat16):
    """Deterministic init mimicking PyTorch's default Linear init
    (uniform(-1/sqrt(fan_in), 1/sqrt(fan_in)) for weight and bias).

    Weight padding / casting is done here (hoisted out of the forward): w3 is
    pre-padded to a multiple of 128 columns for a lane-dense MXU matmul; b3
    keeps its true width so the kernel only writes real Q-value columns.
    """

    def linear_init(k, fan_in, fan_out):
        kw, kb = jax.random.split(k)
        bound = 1.0 / jnp.sqrt(fan_in)
        w = jax.random.uniform(kw, (fan_in, fan_out), jnp.float32, -bound, bound)
        b = jax.random.uniform(kb, (1, fan_out), jnp.float32, -bound, bound)
        return w.astype(weight_dtype), b

    k1, k2, k3 = jax.random.split(key, 3)
    w1, b1 = linear_init(k1, input_dim, hidden)
    w2, b2 = linear_init(k2, hidden, hidden)
    w3, b3 = linear_init(k3, hidden, output_dim)

    out_pad = max(128, pl.cdiv(output_dim, 128) * 128)
    if out_pad != output_dim:
        w3 = jnp.zeros((hidden, out_pad), w3.dtype).at[:, :output_dim].set(w3)
    return (w1, b1, w2, b2, w3, b3)


def dqn_forward_ref(x, params):
    """Pure-JAX f32 reference (weights upcast) for correctness check."""
    w1, b1, w2, b2, w3, b3 = params
    w1, w2, w3 = (w.astype(jnp.float32) for w in (w1, w2, w3))
    out_dim = b3.shape[1]
    h = jnp.maximum(x @ w1 + b1, 0.0)
    h = jnp.maximum(h @ w2 + b2, 0.0)
    return (h @ w3)[:, :out_dim] + b3


if __name__ == "__main__":
    key = jax.random.PRNGKey(0)
    k_params, k_x, k_x2 = jax.random.split(key, 3)

    batch = 8
    input_dim = 32   # e.g. a flattened observation vector
    output_dim = 8   # number of discrete actions

    params = init_dqn_params(k_params, input_dim, output_dim)
    x = jax.random.normal(k_x, (batch, input_dim), jnp.float32)

    # Small-batch path: single grid step, tile_B = 8, narrow output.
    q_values = jax.block_until_ready(dqn_forward(x, params))
    q_ref = dqn_forward_ref(x, params)
    assert q_values.shape == (batch, output_dim)
    assert jnp.allclose(q_values, q_ref, atol=5e-2, rtol=5e-2), "mismatch vs reference"

    # Multi-tile path with a non-divisible batch: exercises the masked edge
    # block, resident weights, and the >=2-tile megacore split.
    x2 = jax.random.normal(k_x2, (300, input_dim), jnp.float32)
    q2 = jax.block_until_ready(dqn_forward(x2, params, tile_b=128))
    q2_ref = dqn_forward_ref(x2, params)
    assert q2.shape == (300, output_dim)
    assert jnp.allclose(q2, q2_ref, atol=5e-2, rtol=5e-2), "mismatch vs reference (tiled)"

    print("KERNEL_OK")
</pallas_src>

<mosaic_0001>
module attributes {stable_mosaic.version = 11 : i64} {
  func.func @dqn_mlp_kernel(%arg0: i32, %arg1: memref<8x32xf32, #tpu.memory_space<vmem>>, %arg2: memref<32x128xbf16, #tpu.memory_space<vmem>>, %arg3: memref<1x128xf32, #tpu.memory_space<vmem>>, %arg4: memref<128x128xbf16, #tpu.memory_space<vmem>>, %arg5: memref<1x128xf32, #tpu.memory_space<vmem>>, %arg6: memref<128x128xbf16, #tpu.memory_space<vmem>>, %arg7: memref<1x8xf32, #tpu.memory_space<vmem>>, %arg8: memref<8x8xf32, #tpu.memory_space<vmem>>) attributes {dimension_semantics = [#tpu.dimension_semantics<parallel>], iteration_bounds = array<i64: 1>, scalar_prefetch = 0 : i64, scratch_operands = 0 : i64, tpu.core_type = #tpu.core_type<tc>, window_params = [{transform_indices = @transform_0, window_bounds = array<i64: 8, 32>}, {pipeline_mode = #tpu.pipeline_mode<synchronous>, transform_indices = @transform_1, window_bounds = array<i64: 32, 128>}, {pipeline_mode = #tpu.pipeline_mode<synchronous>, transform_indices = @transform_2, window_bounds = array<i64: 1, 128>}, {pipeline_mode = #tpu.pipeline_mode<synchronous>, transform_indices = @transform_3, window_bounds = array<i64: 128, 128>}, {pipeline_mode = #tpu.pipeline_mode<synchronous>, transform_indices = @transform_4, window_bounds = array<i64: 1, 128>}, {pipeline_mode = #tpu.pipeline_mode<synchronous>, transform_indices = @transform_5, window_bounds = array<i64: 128, 128>}, {pipeline_mode = #tpu.pipeline_mode<synchronous>, transform_indices = @transform_6, window_bounds = array<i64: 1, 8>}, {transform_indices = @transform_7, window_bounds = array<i64: 8, 8>}]} {
    %c0 = arith.constant 0 : index
    %c0_0 = arith.constant 0 : index
    %0 = vector.load %arg1[%c0, %c0_0] : memref<8x32xf32, #tpu.memory_space<vmem>>, vector<8x32xf32>
    %1 = arith.truncf %0 : vector<8x32xf32> to vector<8x32xbf16>
    %c0_1 = arith.constant 0 : index
    %c0_2 = arith.constant 0 : index
    %2 = vector.load %arg2[%c0_1, %c0_2] : memref<32x128xbf16, #tpu.memory_space<vmem>>, vector<32x128xbf16>
    %cst = arith.constant dense<0.000000e+00> : vector<8x128xf32>
    %3 = tpu.matmul %1, %2, %cst {dimension_numbers = #tpu.dot_dimension_numbers<[1], [0], [0], [1], [0, 0, 1, 1], [], []>} : vector<8x32xbf16>, vector<32x128xbf16>, vector<8x128xf32> -> vector<8x128xf32>
    %c0_3 = arith.constant 0 : index
    %c0_4 = arith.constant 0 : index
    %4 = vector.load %arg3[%c0_3, %c0_4] : memref<1x128xf32, #tpu.memory_space<vmem>>, vector<1x128xf32>
    %5 = vector.broadcast %4 : vector<1x128xf32> to vector<8x128xf32>
    %6 = arith.addf %3, %5 : vector<8x128xf32>
    %cst_5 = arith.constant 0.000000e+00 : f32
    %7 = vector.broadcast %cst_5 : f32 to vector<8x128xf32>
    %8 = arith.maximumf %6, %7 : vector<8x128xf32>
    %9 = arith.truncf %8 : vector<8x128xf32> to vector<8x128xbf16>
    %c0_6 = arith.constant 0 : index
    %c0_7 = arith.constant 0 : index
    %10 = vector.load %arg4[%c0_6, %c0_7] : memref<128x128xbf16, #tpu.memory_space<vmem>>, vector<128x128xbf16>
    %cst_8 = arith.constant dense<0.000000e+00> : vector<8x128xf32>
    %11 = tpu.matmul %9, %10, %cst_8 {dimension_numbers = #tpu.dot_dimension_numbers<[1], [0], [0], [1], [0, 0, 1, 1], [], []>} : vector<8x128xbf16>, vector<128x128xbf16>, vector<8x128xf32> -> vector<8x128xf32>
    %c0_9 = arith.constant 0 : index
    %c0_10 = arith.constant 0 : index
    %12 = vector.load %arg5[%c0_9, %c0_10] : memref<1x128xf32, #tpu.memory_space<vmem>>, vector<1x128xf32>
    %13 = vector.broadcast %12 : vector<1x128xf32> to vector<8x128xf32>
    %14 = arith.addf %11, %13 : vector<8x128xf32>
    %cst_11 = arith.constant 0.000000e+00 : f32
    %15 = vector.broadcast %cst_11 : f32 to vector<8x128xf32>
    %16 = arith.maximumf %14, %15 : vector<8x128xf32>
    %17 = arith.truncf %16 : vector<8x128xf32> to vector<8x128xbf16>
    %c0_12 = arith.constant 0 : index
    %c0_13 = arith.constant 0 : index
    %18 = vector.load %arg6[%c0_12, %c0_13] : memref<128x128xbf16, #tpu.memory_space<vmem>>, vector<128x128xbf16>
    %cst_14 = arith.constant dense<0.000000e+00> : vector<8x128xf32>
    %19 = tpu.matmul %17, %18, %cst_14 {dimension_numbers = #tpu.dot_dimension_numbers<[1], [0], [0], [1], [0, 0, 1, 1], [], []>} : vector<8x128xbf16>, vector<128x128xbf16>, vector<8x128xf32> -> vector<8x128xf32>
    %20 = vector.extract_strided_slice %19 {offsets = [0, 0], sizes = [8, 8], strides = [1, 1]} : vector<8x128xf32> to vector<8x8xf32>
    %c0_15 = arith.constant 0 : index
    %c0_16 = arith.constant 0 : index
    %21 = vector.load %arg7[%c0_15, %c0_16] : memref<1x8xf32, #tpu.memory_space<vmem>>, vector<1x8xf32>
    %22 = vector.broadcast %21 : vector<1x8xf32> to vector<8x8xf32>
    %23 = arith.addf %20, %22 : vector<8x8xf32>
    %c0_17 = arith.constant 0 : index
    %c0_18 = arith.constant 0 : index
    %24 = vector.load %arg8[%c0_17, %c0_18] : memref<8x8xf32, #tpu.memory_space<vmem>>, vector<8x8xf32>
    tpu.vector_store %arg8[%c0_17, %c0_18], %23 {strides = array<i32>} : memref<8x8xf32, #tpu.memory_space<vmem>>, vector<8x8xf32>,
    return
  }
  func.func @transform_0(%arg0: i32) -> (i32, i32) {
    %c0_i32 = arith.constant 0 : i32
    %c0_i32_0 = arith.constant 0 : i32
    return %arg0, %c0_i32 : i32, i32
  }
  func.func @transform_1(%arg0: i32) -> (i32, i32) {
    %c0_i32 = arith.constant 0 : i32
    %c0_i32_0 = arith.constant 0 : i32
    %c0_i32_1 = arith.constant 0 : i32
    return %c0_i32, %c0_i32_0 : i32, i32
  }
  func.func @transform_2(%arg0: i32) -> (i32, i32) {
    %c0_i32 = arith.constant 0 : i32
    %c0_i32_0 = arith.constant 0 : i32
    %c0_i32_1 = arith.constant 0 : i32
    return %c0_i32, %c0_i32_0 : i32, i32
  }
  func.func @transform_3(%arg0: i32) -> (i32, i32) {
    %c0_i32 = arith.constant 0 : i32
    %c0_i32_0 = arith.constant 0 : i32
    %c0_i32_1 = arith.constant 0 : i32
    return %c0_i32, %c0_i32_0 : i32, i32
  }
  func.func @transform_4(%arg0: i32) -> (i32, i32) {
    %c0_i32 = arith.constant 0 : i32
    %c0_i32_0 = arith.constant 0 : i32
    %c0_i32_1 = arith.constant 0 : i32
    return %c0_i32, %c0_i32_0 : i32, i32
  }
  func.func @transform_5(%arg0: i32) -> (i32, i32) {
    %c0_i32 = arith.constant 0 : i32
    %c0_i32_0 = arith.constant 0 : i32
    %c0_i32_1 = arith.constant 0 : i32
    return %c0_i32, %c0_i32_0 : i32, i32
  }
  func.func @transform_6(%arg0: i32) -> (i32, i32) {
    %c0_i32 = arith.constant 0 : i32
    %c0_i32_0 = arith.constant 0 : i32
    %c0_i32_1 = arith.constant 0 : i32
    return %c0_i32, %c0_i32_0 : i32, i32
  }
  func.func @transform_7(%arg0: i32) -> (i32, i32) {
    %c0_i32 = arith.constant 0 : i32
    %c0_i32_0 = arith.constant 0 : i32
    return %arg0, %c0_i32 : i32, i32
  }
}

</mosaic_0001>

<bundles_post_ra>
// kernel: tpu_custom_call.1
= control target key start
LH: loop header
LB: loop body
LE: loop exit
PB: predicated region body
PF: predicated region fallthrough
CT: control target
= control target key end

     0   :  { %12 = vsyncpa [#allocation3], 0  ;;  %s783_s0 = inlined_call_operand.hbm [shape: f32[8,32], index: 0, kind: input, shape index: {}]   ;;  %s784_s1 = inlined_call_operand.hbm [shape: bf16[32,128], index: 1, kind: input, shape index: {}]   ;;  %s785_s2 = inlined_call_operand.vmem [shape: f32[1,128], index: 2, kind: input, shape index: {}]   ;;  %s786_s3 = inlined_call_operand.hbm [shape: bf16[128,128], index: 3, kind: input, shape index: {}]   ;;  %s787_s4 = inlined_call_operand.vmem [shape: f32[1,128], index: 4, kind: input, shape index: {}]   ;;  %s788_s5 = inlined_call_operand.hbm [shape: bf16[128,128], index: 5, kind: input, shape index: {}]   ;;  %s789_s6 = inlined_call_operand.vmem [shape: f32[1,8], index: 6, kind: input, shape index: {}]   ;;  %s790_s7 = inlined_call_operand.hbm [shape: f32[8,8], index: 7, kind: output, shape index: {}]  }
   0x1   :  { %13 = vsyncpa [#allocation6], 0 }
   0x2   :  { %14 = vsyncpa [#allocation9], 0 }
   0x3   :  { %15 = vsyncpa [#allocation4], 0  ;;  %s632_s24 = smov [#allocation5]   ;;  %s514_s28 = scalar_lea.hbm %s784_s1, 256 }
   0x4   :  { %s31_s25 = sshll.u32 %s632_s24, 4  ;;  %p515_p0 = scmp.ne.s32.totalorder %s784_s1, %s514_s28  ;;  %s32_s25 = int_to_ptr.vmem [resolvable:$true] %s31_s25 }
   0x5   :  { %p518_p1 = scmp.lt.u32.totalorder %s514_s28, %s784_s1 }
   0x7   :  { %p520_p2 = pnand %p518_p1, %p515_p0 }
   0x9   :  { %523 = shalt.err (!%p520_p2)
}
   0xa   :  { %s524_s10 = scalar_lea.vmem %s32_s25, 256  ;;  %p529_p4 = scmp.lt.s32.totalorder %s32_s25, %s32_s25 }
   0xb   :  { %p525_p3 = scmp.ne.s32.totalorder %s32_s25, %s524_s10  ;;  %p530_p5 = scmp.lt.s32.totalorder %s524_s10, %s524_s10 }
   0xd   :  { %p531_p6 = por %p530_p5, %p529_p4 }
   0xf   :  { %p532_p7 = pnand %p531_p6, %p525_p3 }
  0x11   :  { %535 = shalt.err (!%p532_p7)
}
  0x12   :  { %s633_s11 = smov 64   ;;  %s634_s12 = smov 4  }
  0x13   :  { %37 = dma.hbm_to_vmem [thread:$0]  %s784_s1, 256, %s32_s25, [#allocation6], %s633_s11, %s633_s11, %s634_s12  }
  0x14   :  { %s635_s15 = smov [#allocation2]   ;;  %s636_s17 = smov [#allocation7]  }
  0x15   :  { %s22_s16 = sshll.u32 %s635_s15, 4  ;;  %s45_s18 = sshll.u32 %s636_s17, 4  ;;  %s23_s16 = int_to_ptr.vmem [resolvable:$true] %s22_s16  ;;  %s46_s18 = int_to_ptr.vmem [resolvable:$true] %s45_s18 }
  0x16   :  { %s536_s21 = scalar_lea.hbm %s783_s0, 128 }
  0x17   :  { %p537_p8 = scmp.ne.s32.totalorder %s783_s0, %s536_s21  ;;  %p540_p9 = scmp.lt.u32.totalorder %s536_s21, %s783_s0 }
  0x19   :  { %p542_p10 = pnand %p540_p9, %p537_p8 }
  0x1b   :  { %545 = shalt.err (!%p542_p10)
}
  0x1c   :  { %s546_s1 = scalar_lea.vmem %s23_s16, 128  ;;  %p551_p12 = scmp.lt.s32.totalorder %s23_s16, %s23_s16 }
  0x1d   :  { %p547_p11 = scmp.ne.s32.totalorder %s23_s16, %s546_s1  ;;  %p552_p13 = scmp.lt.s32.totalorder %s546_s1, %s546_s1 }
  0x1f   :  { %p553_p0 = por %p552_p13, %p551_p12 }
  0x21   :  { %p554_p1 = pnand %p553_p0, %p547_p11 }
  0x23   :  { %557 = shalt.err (!%p554_p1)
}
  0x24   :  { %25 = dma.hbm_to_vmem [thread:$0]  %s783_s0, 128, %s23_s16, [#allocation3]  }
  0x25   :  { %s558_s30 = scalar_lea.hbm %s786_s3, 1024 }
  0x26   :  { %p559_p2 = scmp.ne.s32.totalorder %s786_s3, %s558_s30  ;;  %p562_p3 = scmp.lt.u32.totalorder %s558_s30, %s786_s3 }
  0x28   :  { %p564_p4 = pnand %p562_p3, %p559_p2 }
  0x2a   :  { %567 = shalt.err (!%p564_p4)
}
  0x2b   :  { %s568_s14 = scalar_lea.vmem %s46_s18, 1024  ;;  %p573_p6 = scmp.lt.s32.totalorder %s46_s18, %s46_s18 }
  0x2c   :  { %p569_p5 = scmp.ne.s32.totalorder %s46_s18, %s568_s14  ;;  %p574_p7 = scmp.lt.s32.totalorder %s568_s14, %s568_s14 }
  0x2e   :  { %p575_p8 = por %p574_p7, %p573_p6 }
  0x30   :  { %p576_p9 = pnand %p575_p8, %p569_p5 }
  0x32   :  { %579 = shalt.err (!%p576_p9)
}
  0x33   :  { %51 = dma.hbm_to_vmem [thread:$0]  %s786_s3, 1024, %s46_s18, [#allocation6], %s633_s11, %s633_s11, %s634_s12  }
  0x34   :  { %s637_s16 = smov [#allocation8]   ;;  %s580_s21 = scalar_lea.hbm %s788_s5, 1024 }
  0x35   :  { %s59_s17 = sshll.u32 %s637_s16, 4  ;;  %p581_p10 = scmp.ne.s32.totalorder %s788_s5, %s580_s21  ;;  %s60_s17 = int_to_ptr.vmem [resolvable:$true] %s59_s17 }
  0x36   :  { %p584_p11 = scmp.lt.u32.totalorder %s580_s21, %s788_s5 }
  0x38   :  { %p586_p12 = pnand %p584_p11, %p581_p10 }
  0x3a   :  { %589 = shalt.err (!%p586_p12)
}
  0x3b   :  { %s590_s1 = scalar_lea.vmem %s60_s17, 1024  ;;  %p595_p0 = scmp.lt.s32.totalorder %s60_s17, %s60_s17 }
  0x3c   :  { %p591_p13 = scmp.ne.s32.totalorder %s60_s17, %s590_s1  ;;  %p596_p1 = scmp.lt.s32.totalorder %s590_s1, %s590_s1 }
  0x3e   :  { %p597_p2 = por %p596_p1, %p595_p0 }
  0x40   :  { %p598_p3 = pnand %p597_p2, %p591_p13 }
  0x42   :  { %601 = shalt.err (!%p598_p3)
}
  0x43   :  { %65 = dma.hbm_to_vmem [thread:$0]  %s788_s5, 1024, %s60_s17, [#allocation9], %s633_s11, %s633_s11, %s634_s12  }
  0x44   :  { %624 = dma.done.wait [#allocation3], 128  }
  0x45   :  { %625 = vsyncadd [#allocation3], 4294967168 }
  0x46   :  { %626 = dma.done.wait [#allocation6], 1280  }
  0x47   :  { %627 = vsyncadd [#allocation6], 4294966016 }
  0x48   :  { %628 = dma.done.wait [#allocation9], 1024  }
  0x49   :  { %629 = vsyncadd [#allocation9], 4294966272  ;;  %v638_v0 = vmov 0.0   ;;  %vm639_vm0 = vmmov 0   ;;  %v496_v1 = vld [vmem:[#allocation5] sm:$0xff]   ;;  %v497_v2 = vld [vmem:[#allocation5 + $0x8] sm:$0xff]  }
  0x4a   :  { %439 = vmatprep.subr.bf16.mxu0 %v638_v0  ;;  %443 = vmatprep.mubr.msk.bf16.mxu0 %vm639_vm0, %v638_v0  ;;  %v81_v3 = vld [vmem:[#allocation2] sm:$0xff]  ;;  %v498_v4 = vld [vmem:[#allocation7] sm:$0xff]   ;;  %vm106_vm1 = vcmask 261120   ;;  %v500_v7 = vld [vmem:[#allocation7 + $0x10] sm:$0xff]   ;;  %s640_s28 = smov [#allocation10]   ;;  %vm377_vm2 = vcmask 64512  }
  0x4b   :  { %447 = vmatprep.subr.bf16.mxu1 %v638_v0  ;;  %463 = vmatprep.mubr.msk.bf16.mxu1 %vm639_vm0, %v638_v0  ;;  %v82_v5 = vpack.c.bf16 %v81_v3, %v81_v3  ;;  %v499_v6 = vld [vmem:[#allocation7 + $0x8] sm:$0xff]   ;;  %v501_v8 = vld [vmem:[#allocation7 + $0x18] sm:$0xff]   ;;  %v502_v9 = vld [vmem:[#allocation7 + $0x20] sm:$0xff]   ;;  %s385_s29 = sshll.u32 %s640_s28, 4  ;;  %s386_s29 = int_to_ptr.vmem [resolvable:$true] %s385_s29 }
  0x4c   :  { %440 = vmatpush3.bf16.msra.mxu0 %v496_v1  ;;  %448 = vmatpush3.bf16.msra.mxu1 %v498_v4  ;;  %v503_v10 = vld [vmem:[#allocation7 + $0x28] sm:$0xff]   ;;  %v504_v11 = vld [vmem:[#allocation7 + $0x30] sm:$0xff]   ;;  %v505_v12 = vld [vmem:[#allocation7 + $0x38] sm:$0xff]   ;;  %p607_p5 = scmp.lt.s32.totalorder %s386_s29, %s386_s29 }
  0x4d   :  { %441 = vmatprep.subr.bf16.mxu0 %v638_v0  ;;  %449 = vmatprep.subr.bf16.mxu1 %v638_v0  ;;  %v506_v13 = vld [vmem:[#allocation8] sm:$0xff]   ;;  %v507_v14 = vld [vmem:[#allocation8 + $0x8] sm:$0xff]   ;;  %v508_v15 = vld [vmem:[#allocation8 + $0x10] sm:$0xff]  }
  0x4e   :  { %v509_v16 = vld [vmem:[#allocation8 + $0x18] sm:$0xff]   ;;  %v510_v17 = vld [vmem:[#allocation8 + $0x20] sm:$0xff]   ;;  %v511_v18 = vld [vmem:[#allocation8 + $0x28] sm:$0xff]  }
  0x4f   :  { %v396_v19 = vld [vmem:[%s785_s2] ss:$0 sm:$0xff]  ;;  %v512_v27 = vld [vmem:[#allocation8 + $0x30] sm:$0xff]   ;;  %v513_v28 = vld [vmem:[#allocation8 + $0x38] sm:$0xff]  }
  0x50   :  { %442 = vmatpush3.bf16.msra.mxu0 %v497_v2  ;;  %450 = vmatpush3.bf16.msra.mxu1 %v499_v6  ;;  %v400_v29 = vld [vmem:[%s787_s4] ss:$0 sm:$0xff]  ;;  %s602_s4 = scalar_lea.vmem %s386_s29, 128 }
  0x51   :  { %467 = vmatprep.subr.bf16.mxu0 %v638_v0  ;;  %451 = vmatprep.subr.bf16.mxu1 %v638_v0  ;;  %v417_v37 = vld [vmem:[%s789_s6] ss:$0 sm:$0xff]  ;;  %p603_p4 = scmp.ne.s32.totalorder %s386_s29, %s602_s4  ;;  %p608_p6 = scmp.lt.s32.totalorder %s602_s4, %s602_s4 }
  0x53   :  { %444 = vmatmul.mubr.msk.bf16.vlgmr.msra.gmra.mrb[0].mxu0 %vm106_vm1, %v82_v5  ;;  %p609_p7 = por %p608_p6, %p607_p5 }
  0x54   :  { %483 = vmatprep.mubr.msk.bf16.mxu0 %vm639_vm0, %v638_v0  ;;  %452 = vmatpush3.bf16.msra.mxu1 %v500_v7 }
  0x55   :  { %453 = vmatprep.subr.bf16.mxu1 %v638_v0  ;;  %468 = vmatpush3.bf16.msra.mxu0 %v506_v13  ;;  %p610_p8 = pnand %p609_p7, %p603_p4 }
  0x56   :  { %469 = vmatprep.subr.bf16.mxu0 %v638_v0 }
  0x58   :  { %454 = vmatpush3.bf16.msra.mxu1 %v501_v8 }
  0x59   :  { %455 = vmatprep.subr.bf16.mxu1 %v638_v0  ;;  %470 = vmatpush3.bf16.msra.mxu0 %v507_v14 }
  0x5a   :  { %471 = vmatprep.subr.bf16.mxu0 %v638_v0 }
  0x5c   :  { %456 = vmatpush3.bf16.msra.mxu1 %v502_v9 }
  0x5d   :  { %457 = vmatprep.subr.bf16.mxu1 %v638_v0  ;;  %472 = vmatpush3.bf16.msra.mxu0 %v508_v15 }
  0x5e   :  { %473 = vmatprep.subr.bf16.mxu0 %v638_v0 }
  0x60   :  { %458 = vmatpush3.bf16.msra.mxu1 %v503_v10 }
  0x61   :  { %459 = vmatprep.subr.bf16.mxu1 %v638_v0  ;;  %474 = vmatpush3.bf16.msra.mxu0 %v509_v16 }
  0x62   :  { %475 = vmatprep.subr.bf16.mxu0 %v638_v0 }
  0x64   :  { %460 = vmatpush3.bf16.msra.mxu1 %v504_v11 }
  0x65   :  { %461 = vmatprep.subr.bf16.mxu1 %v638_v0  ;;  %476 = vmatpush3.bf16.msra.mxu0 %v510_v17 }
  0x66   :  { %477 = vmatprep.subr.bf16.mxu0 %v638_v0 }
  0x68   :  { %462 = vmatpush3.bf16.msra.mxu1 %v505_v12 }
  0x69   :  { %478 = vmatpush3.bf16.msra.mxu0 %v511_v18 }
  0x6a   :  { %479 = vmatprep.subr.bf16.mxu0 %v638_v0 }
  0x6d   :  { %480 = vmatpush3.bf16.msra.mxu0 %v512_v27 }
  0x6e   :  { %481 = vmatprep.subr.bf16.mxu0 %v638_v0 }
  0x71   :  { %482 = vmatpush3.bf16.msra.mxu0 %v513_v28 }
 0x126   :  { %v144_v20 = vpop.f32.mrb[0].mxu0 }
 0x127   :  { %v145_v21 = vadd.f32 %v396_v19, %v144_v20  ;;  %v445_v22 = vpop.f32.mrb[1].mxu0 }
 0x128   :  { %v147_v23 = vpop.f32.mrb[2].mxu0 }
 0x129   :  { %v150_v24 = vmax.f32 %v145_v21, 0.0  ;;  %v446_v25 = vpop.f32.mrb[3].mxu0 }
 0x12b   :  { %v151_v26 = vpack.c.bf16 %v150_v24, %v150_v24 }
 0x12d   :  { %464 = vmatmul.mubr.bf16.vlgmr.msra.gmra.mrb[0].mxu1 %v151_v26 }
 0x200   :  { %v257_v30 = vpop.f32.mrb[0].mxu1 }
 0x201   :  { %v258_v31 = vadd.f32 %v400_v29, %v257_v30  ;;  %v465_v32 = vpop.f32.mrb[1].mxu1 }
 0x202   :  { %v260_v33 = vpop.f32.mrb[2].mxu1 }
 0x203   :  { %v263_v34 = vmax.f32 %v258_v31, 0.0  ;;  %v466_v35 = vpop.f32.mrb[3].mxu1 }
 0x205   :  { %v264_v36 = vpack.c.bf16 %v263_v34, %v263_v34 }
 0x207   :  { %484 = vmatmul.mubr.bf16.vlgmr.msra.gmra.mrb[4].mxu0 %v264_v36 }
 0x2da   :  { %v363_v38 = vpop.f32.mrb[4].mxu0 }
 0x2db   :  { %v376_v39 = vadd.f32 %v417_v37, %v363_v38  ;;  %v485_v40 = vpop.f32.mrb[5].mxu0 }
 0x2dc   :  { %v366_v41 = vpop.f32.mrb[6].mxu0 }
 0x2dd   :  { %v486_v42 = vpop.f32.mrb[7].mxu0  ;;  %378 = vst.msk [vmem:[#allocation10] sm:$0xff] %vm377_vm2, %v376_v39 }
 0x2de   :  { %613 = shalt.err (!%p610_p8)
}
 0x2df   :  { %s614_s6 = scalar_lea.hbm %s790_s7, 128 }
 0x2e0   :  { %p615_p9 = scmp.ne.s32.totalorder %s790_s7, %s614_s6  ;;  %p618_p10 = scmp.lt.u32.totalorder %s614_s6, %s790_s7 }
 0x2e2   :  { %p620_p11 = pnand %p618_p10, %p615_p9 }
 0x2e4   :  { %623 = shalt.err (!%p620_p11)
}
 0x2e5   :  { %388 = dma.vmem_to_hbm [thread:$0]  %s386_s29, 128, %s790_s7, [#allocation4]  }
 0x2e6   :  { %630 = dma.done.wait [#allocation4], 128  }
 0x2e7   :  { %631 = vsyncadd [#allocation4], 4294967168 }
 0x2e8   :  { %392 = vsyncpa [#allocation3], 1 }
 0x2e9   :  { %393 = vsyncpa [#allocation6], 1 }
 0x2ea   :  { %394 = vsyncpa [#allocation9], 1 }
 0x2eb   :  { %395 = vsyncpa [#allocation4], 1 }

</bundles_post_ra>
